<compile_context>
chip_gen: v7x
topology: tpu7x:2x2x1
jax: 0.10.0
libtpu: 0.0.40
codegen_flags: <defaults>
</compile_context>

<pallas_src>
import functools

import jax
import jax.numpy as jnp
from jax import lax
from jax.experimental import pallas as pl
from jax.experimental.pallas import tpu as pltpu


def _softplus(x):
    # numerically stable softplus
    return jnp.maximum(x, 0.0) + jnp.log1p(jnp.exp(-jnp.abs(x)))


def _round_up(x, m):
    return ((x + m - 1) // m) * m


def dim_loss_kernel(yb_ref, xr_ref, xf_ref, w0_ref, w1_ref, w2_ref,
                    out_ref, acc_ref, *, tile_hw, hw_valid, padded):
    """Grid = (batch, pixel_chunk, inner_tile).  For one batch element and one
    lane-dense tile of pixels, run the 3-layer 1x1-conv discriminator (as
    matmuls with pixels in the lane dim) on the real and fake tiles and
    accumulate softplus contributions into a (1, tile_hw) VMEM vector; reduce
    across lanes + store the per-(batch, chunk) partial on the last inner step."""
    c = pl.program_id(1)
    i = pl.program_id(2)
    num_inner = pl.num_programs(2)

    @pl.when(i == 0)
    def _():
        acc_ref[...] = jnp.zeros_like(acc_ref)

    w0 = w0_ref[...]                                   # (H0, Cm)  f32, resident
    w1 = w1_ref[...]                                   # (H0, H0)  f32, resident
    w2 = w2_ref[...]                                   # (1,  H0)  f32, resident
    yb = yb_ref[...]                                   # (H0, 1)   per-batch Y bias

    def discriminate(x_ref):
        x = x_ref[...].astype(jnp.float32)             # (Cm, T)  pixels-in-lanes
        h0 = jnp.maximum(
            jnp.dot(w0, x, preferred_element_type=jnp.float32) + yb, 0.0)
        h1 = jnp.maximum(
            jnp.dot(w1, h0, preferred_element_type=jnp.float32), 0.0)
        return jnp.dot(w2, h1, preferred_element_type=jnp.float32)   # (1, T)

    s_real = discriminate(xr_ref)
    s_fake = discriminate(xf_ref)
    contrib = _softplus(-s_real) + _softplus(s_fake)   # (1, T), lane-dense

    if padded:
        base = (c * num_inner + i) * tile_hw
        may_have_pad = base + tile_hw > hw_valid       # scalar predicate

        @pl.when(may_have_pad)
        def _():
            lane = lax.broadcasted_iota(jnp.int32, (1, tile_hw), 1)
            acc_ref[...] += jnp.where(base + lane < hw_valid, contrib, 0.0)

        @pl.when(jnp.logical_not(may_have_pad))
        def _():
            acc_ref[...] += contrib
    else:
        acc_ref[...] += contrib

    @pl.when(i == num_inner - 1)
    def _():
        out_ref[...] = jnp.sum(acc_ref[...], keepdims=True)          # (1, 1)


def dim_loss_og(Y, M, M_fake, w0, w1, w2, *, tile_hw=None):
    """JAX wrapper: layout glue + pallas_call. Returns the scalar local loss."""
    B, Cm, H, W = M.shape
    H0 = w0.shape[0]
    HW = H * W

    hw128 = _round_up(HW, 128)
    if tile_hw is None:
        # Large tiles amortize the ~0.35 us per-grid-step overhead; cap so the
        # (H0, tile) f32 intermediates stay comfortably inside scoped VMEM.
        vmem_cap = max(128, ((4 * 1024 * 1024) // (4 * max(H0, 8))) // 128 * 128)
        tile_hw = min(4096, vmem_cap, hw128)
    tile_hw = max(128, _round_up(tile_hw, 128))
    tile_hw = min(tile_hw, hw128)

    num_t = -(-hw128 // tile_hw)                 # pixel tiles per batch element
    num_chunks = 2 if num_t >= 2 else 1          # v7x megacore split of pixel axis
    num_inner = -(-num_t // num_chunks)
    hw_pad = num_chunks * num_inner * tile_hw
    padded = hw_pad != HW

    def to_pixels(Mx):
        # native channel-major layout -> (B, Cm, HW); pixels end up in lanes
        x = Mx.reshape(B, Cm, HW)
        if hw_pad != HW:
            x = jnp.pad(x, ((0, 0), (0, 0), (0, hw_pad - HW)))
        return x.astype(jnp.bfloat16)

    x_real = to_pixels(M)
    x_fake = to_pixels(M_fake)

    # Split the first 1x1-conv weight: M channels feed the in-kernel matmul,
    # Y channels collapse into a per-batch bias column (Y is constant over H, W).
    # torch.cat((M, Y_rep), dim=1) => M channels first, then Y channels.
    w0_full = w0[:, :, 0, 0].astype(jnp.float32)               # (H0, Cm+Cv)
    w0_m = w0_full[:, :Cm]                                     # (H0, Cm)
    y_bias = (Y.astype(jnp.float32) @ w0_full[:, Cm:].T)       # (B, H0)
    y_bias = y_bias[:, :, None]                                # (B, H0, 1)

    w1_m = w1[:, :, 0, 0].astype(jnp.float32)                  # (H0, H0)
    w2_m = w2[:, :, 0, 0].astype(jnp.float32)                  # (1, H0)

    n_pix = B * HW
    cost = pl.CostEstimate(
        flops=4 * B * hw_pad * (Cm * H0 + H0 * H0 + H0),
        transcendentals=4 * n_pix,
        bytes_accessed=(2 * B * hw_pad * Cm * 2                 # bf16 pixel slabs
                        + (Cm * H0 + H0 * H0 + H0 + B * H0) * 4  # f32 weights + bias
                        + B * num_chunks * 4),                  # partial sums
    )

    kernel = functools.partial(dim_loss_kernel, tile_hw=tile_hw, hw_valid=HW,
                               padded=padded)

    pix_map = lambda b, c, i: (b, 0, c * num_inner + i)

    partials = pl.pallas_call(
        kernel,
        out_shape=jax.ShapeDtypeStruct((B, num_chunks, 1, 1), jnp.float32),
        grid_spec=pltpu.PrefetchScalarGridSpec(
            num_scalar_prefetch=0,
            grid=(B, num_chunks, num_inner),
            in_specs=[
                pl.BlockSpec((None, H0, 1), lambda b, c, i: (b, 0, 0)),  # y_bias
                pl.BlockSpec((None, Cm, tile_hw), pix_map),              # real pixels
                pl.BlockSpec((None, Cm, tile_hw), pix_map),              # fake pixels
                pl.BlockSpec((H0, Cm), lambda b, c, i: (0, 0)),          # w0 (resident)
                pl.BlockSpec((H0, H0), lambda b, c, i: (0, 0)),          # w1 (resident)
                pl.BlockSpec((1, H0), lambda b, c, i: (0, 0)),           # w2 (resident)
            ],
            out_specs=pl.BlockSpec((None, None, 1, 1),
                                   lambda b, c, i: (b, c, 0, 0)),
            scratch_shapes=[pltpu.VMEM((1, tile_hw), jnp.float32)],
        ),
        compiler_params=pltpu.CompilerParams(
            dimension_semantics=("parallel", "parallel", "arbitrary")),
        cost_estimate=cost,
    )(y_bias, x_real, x_fake, w0_m, w1_m, w2_m)

    # mean over the (B, 1, H, W) score maps == sum / (B*H*W)
    return jnp.sum(partials) / n_pix


def dim_loss_reference(Y, M, M_fake, w0, w1, w2):
    """Pure-JAX reference matching the PyTorch forward (f32 throughout)."""
    B, Cm, H, W = M.shape
    Cv = Y.shape[1]
    Y_rep = jnp.broadcast_to(Y[:, :, None, None], (B, Cv, H, W))
    x_real = jnp.concatenate([M, Y_rep], axis=1)
    x_fake = jnp.concatenate([M_fake, Y_rep], axis=1)

    def local_d(x):
        def conv1x1(h, w):
            return jnp.einsum('bchw,oc->bohw', h, w[:, :, 0, 0])
        h = jax.nn.relu(conv1x1(x, w0))
        h = jax.nn.relu(conv1x1(h, w1))
        return conv1x1(h, w2)

    Ej = -jnp.mean(jax.nn.softplus(-local_d(x_real)))
    Em = -jnp.mean(jax.nn.softplus(local_d(x_fake)))
    return -(Em + Ej)


if __name__ == "__main__":
    # Small shapes consistent with the module (M_channels, V_channels, M_size, interm).
    B, Cm, Cv, H, W = 2, 16, 16, 8, 8
    interm = 64
    C_in = Cm + Cv

    key = jax.random.PRNGKey(0)
    k1, k2, k3, k4, k5, k6 = jax.random.split(key, 6)
    Y = jax.random.normal(k1, (B, Cv), jnp.float32)
    M = jax.random.normal(k2, (B, Cm, H, W), jnp.float32)
    M_fake = jax.random.normal(k3, (B, Cm, H, W), jnp.float32)

    # Deterministic synthetic conv weights (out, in, 1, 1), no bias.
    w0 = jax.random.normal(k4, (interm, C_in, 1, 1), jnp.float32) * 0.1
    w1 = jax.random.normal(k5, (interm, interm, 1, 1), jnp.float32) * 0.1
    w2 = jax.random.normal(k6, (1, interm, 1, 1), jnp.float32) * 0.1

    loss = dim_loss_og(Y, M, M_fake, w0, w1, w2)
    loss = jax.block_until_ready(loss)

    ref = dim_loss_reference(Y, M, M_fake, w0, w1, w2)
    ref = jax.block_until_ready(ref)

    # bf16 pixel inputs with f32 weights/activations/accumulation.
    assert jnp.allclose(loss, ref, rtol=1e-2, atol=1e-2), (loss, ref)
    print("KERNEL_OK")
</pallas_src>

<mosaic_0001>
module attributes {stable_mosaic.version = 11 : i64} {
  func.func @dim_loss_kernel(%arg0: i32, %arg1: i32, %arg2: i32, %arg3: memref<1x64x1xf32, #tpu.memory_space<vmem>>, %arg4: memref<1x16x128xbf16, #tpu.memory_space<vmem>>, %arg5: memref<1x16x128xbf16, #tpu.memory_space<vmem>>, %arg6: memref<64x16xf32, #tpu.memory_space<vmem>>, %arg7: memref<64x64xf32, #tpu.memory_space<vmem>>, %arg8: memref<1x64xf32, #tpu.memory_space<vmem>>, %arg9: memref<1x1x1x1xf32, #tpu.memory_space<vmem>>, %arg10: memref<1x128xf32, #tpu.memory_space<vmem>>) attributes {dimension_semantics = [#tpu.dimension_semantics<parallel>, #tpu.dimension_semantics<parallel>, #tpu.dimension_semantics<arbitrary>], iteration_bounds = array<i64: 2, 1, 1>, scalar_prefetch = 0 : i64, scratch_operands = 1 : i64, tpu.core_type = #tpu.core_type<tc>, window_params = [{transform_indices = @transform_0, window_bounds = array<i64: 1, 64, 1>}, {transform_indices = @transform_1, window_bounds = array<i64: 1, 16, 128>}, {transform_indices = @transform_2, window_bounds = array<i64: 1, 16, 128>}, {pipeline_mode = #tpu.pipeline_mode<synchronous>, transform_indices = @transform_3, window_bounds = array<i64: 64, 16>}, {pipeline_mode = #tpu.pipeline_mode<synchronous>, transform_indices = @transform_4, window_bounds = array<i64: 64, 64>}, {pipeline_mode = #tpu.pipeline_mode<synchronous>, transform_indices = @transform_5, window_bounds = array<i64: 1, 64>}, {transform_indices = @transform_6, window_bounds = array<i64: 1, 1, 1, 1>}]} {
    %c0_i32 = arith.constant 0 : i32
    %0 = arith.cmpi eq, %arg2, %c0_i32 : i32
    %1 = arith.extui %0 : i1 to i32
    %c0_i32_0 = arith.constant 0 : i32
    %2 = arith.cmpi ne, %1, %c0_i32_0 : i32
    scf.if %2 {
      %cst_34 = arith.constant 0.000000e+00 : f32
      %64 = vector.broadcast %cst_34 : f32 to vector<1x128xf32>
      %c0_35 = arith.constant 0 : index
      %c0_36 = arith.constant 0 : index
      %65 = vector.load %arg10[%c0_35, %c0_36] : memref<1x128xf32, #tpu.memory_space<vmem>>, vector<1x128xf32>
      tpu.vector_store %arg10[%c0_35, %c0_36], %64 {strides = array<i32>} : memref<1x128xf32, #tpu.memory_space<vmem>>, vector<1x128xf32>,
    } else {
    }
    %c0 = arith.constant 0 : index
    %c0_1 = arith.constant 0 : index
    %3 = vector.load %arg6[%c0, %c0_1] : memref<64x16xf32, #tpu.memory_space<vmem>>, vector<64x16xf32>
    %c0_2 = arith.constant 0 : index
    %c0_3 = arith.constant 0 : index
    %4 = vector.load %arg7[%c0_2, %c0_3] : memref<64x64xf32, #tpu.memory_space<vmem>>, vector<64x64xf32>
    %c0_4 = arith.constant 0 : index
    %c0_5 = arith.constant 0 : index
    %5 = vector.load %arg8[%c0_4, %c0_5] : memref<1x64xf32, #tpu.memory_space<vmem>>, vector<1x64xf32>
    %c0_6 = arith.constant 0 : index
    %c0_7 = arith.constant 0 : index
    %c0_8 = arith.constant 0 : index
    %6 = vector.load %arg3[%c0_6, %c0_7, %c0_8] : memref<1x64x1xf32, #tpu.memory_space<vmem>>, vector<1x64x1xf32>
    %7 = vector.shape_cast %6 : vector<1x64x1xf32> to vector<64x1xf32>
    %c0_9 = arith.constant 0 : index
    %c0_10 = arith.constant 0 : index
    %c0_11 = arith.constant 0 : index
    %8 = vector.load %arg4[%c0_9, %c0_10, %c0_11] : memref<1x16x128xbf16, #tpu.memory_space<vmem>>, vector<1x16x128xbf16>
    %9 = vector.shape_cast %8 : vector<1x16x128xbf16> to vector<16x128xbf16>
    %10 = arith.extf %9 : vector<16x128xbf16> to vector<16x128xf32>
    %cst = arith.constant dense<0.000000e+00> : vector<64x128xf32>
    %11 = tpu.matmul %3, %10, %cst {dimension_numbers = #tpu.dot_dimension_numbers<[1], [0], [0], [1], [0, 0, 1, 1], [], []>} : vector<64x16xf32>, vector<16x128xf32>, vector<64x128xf32> -> vector<64x128xf32>
    %12 = vector.broadcast %7 : vector<64x1xf32> to vector<64x128xf32>
    %13 = arith.addf %11, %12 : vector<64x128xf32>
    %cst_12 = arith.constant 0.000000e+00 : f32
    %14 = vector.broadcast %cst_12 : f32 to vector<64x128xf32>
    %15 = arith.maximumf %13, %14 : vector<64x128xf32>
    %cst_13 = arith.constant dense<0.000000e+00> : vector<64x128xf32>
    %16 = tpu.matmul %4, %15, %cst_13 {dimension_numbers = #tpu.dot_dimension_numbers<[1], [0], [0], [1], [0, 0, 1, 1], [], []>} : vector<64x64xf32>, vector<64x128xf32>, vector<64x128xf32> -> vector<64x128xf32>
    %cst_14 = arith.constant 0.000000e+00 : f32
    %17 = vector.broadcast %cst_14 : f32 to vector<64x128xf32>
    %18 = arith.maximumf %16, %17 : vector<64x128xf32>
    %cst_15 = arith.constant dense<0.000000e+00> : vector<1x128xf32>
    %19 = tpu.matmul %5, %18, %cst_15 {dimension_numbers = #tpu.dot_dimension_numbers<[1], [0], [0], [1], [0, 0, 1, 1], [], []>} : vector<1x64xf32>, vector<64x128xf32>, vector<1x128xf32> -> vector<1x128xf32>
    %c0_16 = arith.constant 0 : index
    %c0_17 = arith.constant 0 : index
    %c0_18 = arith.constant 0 : index
    %20 = vector.load %arg5[%c0_16, %c0_17, %c0_18] : memref<1x16x128xbf16, #tpu.memory_space<vmem>>, vector<1x16x128xbf16>
    %21 = vector.shape_cast %20 : vector<1x16x128xbf16> to vector<16x128xbf16>
    %22 = arith.extf %21 : vector<16x128xbf16> to vector<16x128xf32>
    %cst_19 = arith.constant dense<0.000000e+00> : vector<64x128xf32>
    %23 = tpu.matmul %3, %22, %cst_19 {dimension_numbers = #tpu.dot_dimension_numbers<[1], [0], [0], [1], [0, 0, 1, 1], [], []>} : vector<64x16xf32>, vector<16x128xf32>, vector<64x128xf32> -> vector<64x128xf32>
    %24 = vector.broadcast %7 : vector<64x1xf32> to vector<64x128xf32>
    %25 = arith.addf %23, %24 : vector<64x128xf32>
    %cst_20 = arith.constant 0.000000e+00 : f32
    %26 = vector.broadcast %cst_20 : f32 to vector<64x128xf32>
    %27 = arith.maximumf %25, %26 : vector<64x128xf32>
    %cst_21 = arith.constant dense<0.000000e+00> : vector<64x128xf32>
    %28 = tpu.matmul %4, %27, %cst_21 {dimension_numbers = #tpu.dot_dimension_numbers<[1], [0], [0], [1], [0, 0, 1, 1], [], []>} : vector<64x64xf32>, vector<64x128xf32>, vector<64x128xf32> -> vector<64x128xf32>
    %cst_22 = arith.constant 0.000000e+00 : f32
    %29 = vector.broadcast %cst_22 : f32 to vector<64x128xf32>
    %30 = arith.maximumf %28, %29 : vector<64x128xf32>
    %cst_23 = arith.constant dense<0.000000e+00> : vector<1x128xf32>
    %31 = tpu.matmul %5, %30, %cst_23 {dimension_numbers = #tpu.dot_dimension_numbers<[1], [0], [0], [1], [0, 0, 1, 1], [], []>} : vector<1x64xf32>, vector<64x128xf32>, vector<1x128xf32> -> vector<1x128xf32>
    %cst_24 = arith.constant 0.000000e+00 : f32
    %32 = vector.broadcast %cst_24 : f32 to vector<1x128xf32>
    %33 = arith.subf %32, %19 : vector<1x128xf32>
    %cst_25 = arith.constant 0.000000e+00 : f32
    %34 = vector.broadcast %cst_25 : f32 to vector<1x128xf32>
    %35 = arith.maximumf %33, %34 : vector<1x128xf32>
    %36 = math.absf %33 : vector<1x128xf32>
    %cst_26 = arith.constant 0.000000e+00 : f32
    %37 = vector.broadcast %cst_26 : f32 to vector<1x128xf32>
    %38 = arith.subf %37, %36 : vector<1x128xf32>
    %39 = math.exp %38 : vector<1x128xf32>
    %40 = math.log1p %39 : vector<1x128xf32>
    %41 = arith.addf %35, %40 : vector<1x128xf32>
    %cst_27 = arith.constant 0.000000e+00 : f32
    %42 = vector.broadcast %cst_27 : f32 to vector<1x128xf32>
    %43 = arith.maximumf %31, %42 : vector<1x128xf32>
    %44 = math.absf %31 : vector<1x128xf32>
    %cst_28 = arith.constant 0.000000e+00 : f32
    %45 = vector.broadcast %cst_28 : f32 to vector<1x128xf32>
    %46 = arith.subf %45, %44 : vector<1x128xf32>
    %47 = math.exp %46 : vector<1x128xf32>
    %48 = math.log1p %47 : vector<1x128xf32>
    %49 = arith.addf %43, %48 : vector<1x128xf32>
    %50 = arith.addf %41, %49 : vector<1x128xf32>
    %c1_i32 = arith.constant 1 : i32
    %51 = arith.muli %arg1, %c1_i32 : i32
    %52 = arith.addi %51, %arg2 : i32
    %c128_i32 = arith.constant 128 : i32
    %53 = arith.muli %52, %c128_i32 : i32
    %c128_i32_29 = arith.constant 128 : i32
    %54 = arith.addi %53, %c128_i32_29 : i32
    %c64_i32 = arith.constant 64 : i32
    %55 = arith.cmpi sgt, %54, %c64_i32 : i32
    %56 = arith.extui %55 : i1 to i32
    %c0_i32_30 = arith.constant 0 : i32
    %57 = arith.cmpi ne, %56, %c0_i32_30 : i32
    scf.if %57 {
      %64 = tpu.iota {dimensions = array<i32: 1>} : vector<1x128xi32>
      %c0_34 = arith.constant 0 : index
      %c0_35 = arith.constant 0 : index
      %65 = vector.load %arg10[%c0_34, %c0_35] : memref<1x128xf32, #tpu.memory_space<vmem>>, vector<1x128xf32>
      %66 = vector.broadcast %53 : i32 to vector<1x128xi32>
      %67 = arith.addi %66, %64 : vector<1x128xi32>
      %c64_i32_36 = arith.constant 64 : i32
      %68 = vector.broadcast %c64_i32_36 : i32 to vector<1x128xi32>
      %69 = arith.cmpi slt, %67, %68 : vector<1x128xi32>
      %cst_37 = arith.constant 0.000000e+00 : f32
      %70 = vector.broadcast %cst_37 : f32 to vector<1x128xf32>
      %71 = arith.select %69, %50, %70 : vector<1x128xi1>, vector<1x128xf32>
      %72 = arith.addf %65, %71 : vector<1x128xf32>
      %c0_38 = arith.constant 0 : index
      %c0_39 = arith.constant 0 : index
      %73 = vector.load %arg10[%c0_38, %c0_39] : memref<1x128xf32, #tpu.memory_space<vmem>>, vector<1x128xf32>
      tpu.vector_store %arg10[%c0_38, %c0_39], %72 {strides = array<i32>} : memref<1x128xf32, #tpu.memory_space<vmem>>, vector<1x128xf32>,
    } else {
    }
    %true = arith.constant true
    %58 = arith.xori %55, %true : i1
    %59 = arith.extui %58 : i1 to i32
    %c0_i32_31 = arith.constant 0 : i32
    %60 = arith.cmpi ne, %59, %c0_i32_31 : i32
    scf.if %60 {
      %c0_34 = arith.constant 0 : index
      %c0_35 = arith.constant 0 : index
      %64 = vector.load %arg10[%c0_34, %c0_35] : memref<1x128xf32, #tpu.memory_space<vmem>>, vector<1x128xf32>
      %65 = arith.addf %64, %50 : vector<1x128xf32>
      %c0_36 = arith.constant 0 : index
      %c0_37 = arith.constant 0 : index
      %66 = vector.load %arg10[%c0_36, %c0_37] : memref<1x128xf32, #tpu.memory_space<vmem>>, vector<1x128xf32>
      tpu.vector_store %arg10[%c0_36, %c0_37], %65 {strides = array<i32>} : memref<1x128xf32, #tpu.memory_space<vmem>>, vector<1x128xf32>,
    } else {
    }
    %c0_i32_32 = arith.constant 0 : i32
    %61 = arith.cmpi eq, %arg2, %c0_i32_32 : i32
    %62 = arith.extui %61 : i1 to i32
    %c0_i32_33 = arith.constant 0 : i32
    %63 = arith.cmpi ne, %62, %c0_i32_33 : i32
    scf.if %63 {
      %c0_34 = arith.constant 0 : index
      %c0_35 = arith.constant 0 : index
      %64 = vector.load %arg10[%c0_34, %c0_35] : memref<1x128xf32, #tpu.memory_space<vmem>>, vector<1x128xf32>
      %65 = vector.shape_cast %64 : vector<1x128xf32> to vector<1x1x128xf32>
      %cst_36 = arith.constant dense<0.000000e+00> : vector<1xf32>
      %66 = vector.multi_reduction <add>, %65, %cst_36 [1, 2] : vector<1x1x128xf32> to vector<1xf32>
      %67 = vector.shape_cast %66 : vector<1xf32> to vector<1x1x1xf32>
      %68 = vector.extract %67[0, 0, 0] : f32 from vector<1x1x1xf32>
      %69 = vector.broadcast %68 : f32 to vector<1x1xf32>
      %c0_37 = arith.constant 0 : index
      %c0_38 = arith.constant 0 : index
      %c0_39 = arith.constant 0 : index
      %c0_40 = arith.constant 0 : index
      %70 = vector.load %arg9[%c0_37, %c0_38, %c0_39, %c0_40] : memref<1x1x1x1xf32, #tpu.memory_space<vmem>>, vector<1x1x1x1xf32>
      %71 = vector.shape_cast %70 : vector<1x1x1x1xf32> to vector<1x1xf32>
      %72 = vector.shape_cast %69 : vector<1x1xf32> to vector<1x1x1x1xf32>
      tpu.vector_store %arg9[%c0_37, %c0_38, %c0_39, %c0_40], %72 {strides = array<i32>} : memref<1x1x1x1xf32, #tpu.memory_space<vmem>>, vector<1x1x1x1xf32>,
    } else {
    }
    return
  }
  func.func @transform_0(%arg0: i32, %arg1: i32, %arg2: i32) -> (i32, i32, i32) {
    %c0_i32 = arith.constant 0 : i32
    %c0_i32_0 = arith.constant 0 : i32
    %c0_i32_1 = arith.constant 0 : i32
    return %arg0, %c0_i32, %c0_i32_0 : i32, i32, i32
  }
  func.func @transform_1(%arg0: i32, %arg1: i32, %arg2: i32) -> (i32, i32, i32) {
    %c1_i32 = arith.constant 1 : i32
    %0 = arith.muli %arg1, %c1_i32 : i32
    %1 = arith.addi %0, %arg2 : i32
    %c0_i32 = arith.constant 0 : i32
    %c0_i32_0 = arith.constant 0 : i32
    return %arg0, %c0_i32, %1 : i32, i32, i32
  }
  func.func @transform_2(%arg0: i32, %arg1: i32, %arg2: i32) -> (i32, i32, i32) {
    %c1_i32 = arith.constant 1 : i32
    %0 = arith.muli %arg1, %c1_i32 : i32
    %1 = arith.addi %0, %arg2 : i32
    %c0_i32 = arith.constant 0 : i32
    %c0_i32_0 = arith.constant 0 : i32
    return %arg0, %c0_i32, %1 : i32, i32, i32
  }
  func.func @transform_3(%arg0: i32, %arg1: i32, %arg2: i32) -> (i32, i32) {
    %c0_i32 = arith.constant 0 : i32
    %c0_i32_0 = arith.constant 0 : i32
    %c0_i32_1 = arith.constant 0 : i32
    return %c0_i32, %c0_i32_0 : i32, i32
  }
  func.func @transform_4(%arg0: i32, %arg1: i32, %arg2: i32) -> (i32, i32) {
    %c0_i32 = arith.constant 0 : i32
    %c0_i32_0 = arith.constant 0 : i32
    %c0_i32_1 = arith.constant 0 : i32
    return %c0_i32, %c0_i32_0 : i32, i32
  }
  func.func @transform_5(%arg0: i32, %arg1: i32, %arg2: i32) -> (i32, i32) {
    %c0_i32 = arith.constant 0 : i32
    %c0_i32_0 = arith.constant 0 : i32
    %c0_i32_1 = arith.constant 0 : i32
    return %c0_i32, %c0_i32_0 : i32, i32
  }
  func.func @transform_6(%arg0: i32, %arg1: i32, %arg2: i32) -> (i32, i32, i32, i32) {
    %c0_i32 = arith.constant 0 : i32
    %c0_i32_0 = arith.constant 0 : i32
    %c0_i32_1 = arith.constant 0 : i32
    return %arg0, %arg1, %c0_i32, %c0_i32_0 : i32, i32, i32, i32
  }
}

</mosaic_0001>

<bundles_post_ra>
// kernel: tpu_custom_call.1
= control target key start
LH: loop header
LB: loop body
LE: loop exit
PB: predicated region body
PF: predicated region fallthrough
CT: control target
= control target key end

     0   :  { %s1672_s21 = smov 0   ;;  %s1674_s22 = smov 0   ;;  %s1914_s0 = inlined_call_operand.vmem [shape: f32[2,64,1], index: 0, kind: input, shape index: {}]   ;;  %s1915_s1 = inlined_call_operand.vmem [shape: bf16[2,16,128], index: 1, kind: input, shape index: {}]   ;;  %s1916_s2 = inlined_call_operand.vmem [shape: bf16[2,16,128], index: 2, kind: input, shape index: {}]   ;;  %s1917_s3 = inlined_call_operand.vmem [shape: f32[64,16], index: 3, kind: input, shape index: {}]   ;;  %s1918_s4 = inlined_call_operand.vmem [shape: f32[64,64], index: 4, kind: input, shape index: {}]   ;;  %s1919_s5 = inlined_call_operand.vmem [shape: f32[1,64], index: 5, kind: input, shape index: {}]   ;;  %s1920_s6 = inlined_call_operand.vmem [shape: f32[2,1,1,1], index: 6, kind: output, shape index: {}]  }
   0x1   :  { %s1676_s23 = smov 0  }
   0x2 LB: > { %s35_s24 = sadd.s32 1, %s1627_s22  ;;  %p1255_p0 = scmp.ge.s32.totalorder %s1631_s23, 1  ;;  %s1631_s23 = sphi %s1676_s23, %s16_s23   ;;  %s1627_s22 = sphi %s1674_s22, %s1922_s22   ;;  %s1623_s21 = sphi %s1672_s21, %s1921_s21  }
   0x3   : > { %p37_p1 = scmp.ge.s32.totalorder %s35_s24, 2  ;;  %p271_p2 = scmp.lt.s32.totalorder %s1631_s23, 3 }
   0x5   : > { %s1924_s24 = smov (%p37_p1, %s35_s24), 0  ;;  %p272_p3 = pnand %p1255_p0, %p271_p2 }
   0x6   : > { %p320_p4 = scmp.lt.s32.totalorder (!%p272_p3), %s1623_s21, 1  ;;  %v1693_v0 = vld [vmem:[%s1917_s3] sm:$0xff] (!%p272_p3)  ;;  %vm425_vm0 = vcmask (!%p272_p3), 130048   ;;  %v1633_v1 = vmov (!%p272_p3), 0   ;;  %v1712_v5 = vld [vmem:[%s1917_s3 + $0x8] sm:$0xff] (!%p272_p3)  ;;  %v1717_v7 = vld [vmem:[%s1917_s3 + $0x10] sm:$0xff] (!%p272_p3) }
   0x7   : > { %275 = sbr.rel (%p272_p3) target bundleno = 1427 (0x593), region = 44  ;;  %1383 = vmatprep.mubr.msk.f32.mxu0 (!%p272_p3), %vm425_vm0, %v1693_v0  ;;  %1599 = vset.pattern.permute.xlu0 (!%p272_p3), %v1633_v1  ;;  %v1726_v9 = vld [vmem:[%s1917_s3 + $0x18] sm:$0xff] (!%p272_p3)  ;;  %v1731_v11 = vld [vmem:[%s1917_s3 + $0x20] sm:$0xff] (!%p272_p3)  ;;  %v1740_v13 = vld [vmem:[%s1917_s3 + $0x28] sm:$0xff] (!%p272_p3)  ;;  %vm563_vm1 = vcmask (!%p272_p3), 523264   ;;  %v1634_v62 = vmov (!%p272_p3), 0.0|0.0  }
   0x8   : > { %1600 = vset.pattern.permute.xlu1 (!%p272_p3), %v1633_v1  ;;  %v1745_v15 = vld [vmem:[%s1917_s3 + $0x30] sm:$0xff] (!%p272_p3)  ;;  %v1754_v17 = vld [vmem:[%s1917_s3 + $0x38] sm:$0xff] (!%p272_p3)  ;;  %v364_v18 = vld [vmem:[%s1918_s4] sm:$0xff] (!%p272_p3)  ;;  %v1635_v63 = vmov (!%p272_p3), 0.0   ;;  %vm1636_vm2 = vmmov (!%p272_p3), 0   ;;  %vm1133_vm6 = vcmask (!%p272_p3), 1040384  }
   0x9   : > { %1411 = vmatprep.mubr.msk.f32.mxu1 (!%p272_p3), %vm563_vm1, %v364_v18  ;;  %v1789_v55 = vld [vmem:[%s1918_s4 + $0x8] sm:$0xff] (!%p272_p3)  ;;  %v1794_v56 = vld [vmem:[%s1918_s4 + $0x10] sm:$0xff] (!%p272_p3)  ;;  %v1803_v57 = vld [vmem:[%s1918_s4 + $0x18] sm:$0xff] (!%p272_p3)  ;;  %355 = vst [vmem:[#allocation2] sm:$0x1] (!%p272_p3), %v1635_v63  ;;  %vm1145_vm7 = vcmask (!%p272_p3), 0  }
   0xa   : > { %v1808_v58 = vld [vmem:[%s1918_s4 + $0x20] sm:$0xff] (!%p272_p3)  ;;  %v1817_v59 = vld [vmem:[%s1918_s4 + $0x28] sm:$0xff] (!%p272_p3)  ;;  %v1822_v60 = vld [vmem:[%s1918_s4 + $0x30] sm:$0xff] (!%p272_p3) }
   0xb   : > { %v1831_v61 = vld [vmem:[%s1918_s4 + $0x38] sm:$0xff] (!%p272_p3) }
   0xe   : > { %s1926_s21 = smov (!%p320_p4, %s1623_s21), 1 }
   0xf   : > { %s1298_s27 = sshll.u32 %s1926_s21, 6  ;;  %s1299_s28 = sshll.u32 %s1926_s21, 3 }
  0x10   : > { %s324_s7 = scalar_lea.vmem %s1914_s0, %s1298_s27  ;;  %s333_s10 = scalar_lea.vmem %s1915_s1, %s1299_s28 }
  0x11   : > { %v1302_v2 = vld [vmem:[%s333_s10] sm:$0xff]   ;;  %v375_v4 = vld [vmem:[%s324_s7 + $0x10] sm:$0xff]  ;;  %v374_v6 = vld [vmem:[%s324_s7 + $0x8] sm:$0xff]  ;;  %s343_s29 = scalar_lea.vmem %s1916_s2, %s1299_s28  ;;  %s350_s9 = scalar_lea.vmem %s1920_s6, %s1926_s21 }
  0x12   : > { %v373_v3 = vld [vmem:[%s324_s7] sm:$0xff]  ;;  %1506 = vmatprep.subr.bf16.mxu0 %v1302_v2  ;;  %397 = vperm.xlu1 %1600, %v375_v4   ;;  %v376_v8 = vld [vmem:[%s324_s7 + $0x18] sm:$0xff]  ;;  %v378_v12 = vld [vmem:[%s324_s7 + $0x28] sm:$0xff] }
  0x13   : > { %387 = vperm.xlu0 %1599, %v373_v3   ;;  %1508 = vmatpush3.bf16.msra.mxu0 %v1302_v2  ;;  %v377_v10 = vld [vmem:[%s324_s7 + $0x20] sm:$0xff]  ;;  %v379_v14 = vld [vmem:[%s324_s7 + $0x30] sm:$0xff]  ;;  %v380_v16 = vld [vmem:[%s324_s7 + $0x38] sm:$0xff] }
  0x14   : > { %1525 = vmatprep.subr.bf16.mxu0 %v1634_v62 }
  0x16   : > { %1384 = vmatmul.mubr.msk.f32.vlgmr.msra.gmra.mrb[0].mxu0 %vm425_vm0, %v1712_v5  ;;  %402 = vperm.xlu1 %1600, %v376_v8  }
  0x17   : > { %392 = vperm.xlu0 %1599, %v374_v6   ;;  %1386 = vmatprep.mubr.msk.f32.mxu0 %vm425_vm0, %v1717_v7 }
  0x1a   : > { %1387 = vmatmul.mubr.msk.f32.gmra.mrb[2].mxu0 %vm425_vm0, %v1726_v9  ;;  %412 = vperm.xlu1 %1600, %v378_v12  }
  0x1b   : > { %407 = vperm.xlu0 %1599, %v377_v10   ;;  %1389 = vmatprep.mubr.msk.f32.mxu0 %vm425_vm0, %v1731_v11 }
  0x1e   : > { %1390 = vmatmul.mubr.msk.f32.gmra.mrb[4].mxu0 %vm425_vm0, %v1740_v13  ;;  %422 = vperm.xlu1 %1600, %v380_v16  }
  0x1f   : > { %417 = vperm.xlu0 %1599, %v379_v14   ;;  %1392 = vmatprep.mubr.msk.f32.mxu0 %vm425_vm0, %v1745_v15 }
  0x22   : > { %1393 = vmatmul.mubr.msk.f32.gmra.mrb[6].mxu0 %vm425_vm0, %v1754_v17 }
  0x23   : > { %1439 = vmatprep.mubr.msk.f32.mxu0 %vm1636_vm2, %v1635_v63 }
  0x91   : > { %v1764_v20 = vpop.permute.xlu1 %397 }
  0x92   : > { %v1762_v19 = vpop.permute.xlu0 %387 }
  0x95   : > { %v1768_v22 = vpop.permute.xlu1 %402 }
  0x96   : > { %v1766_v21 = vpop.permute.xlu0 %392 }
  0x99   : > { %v1773_v32 = vpop.permute.xlu1 %412 }
  0x9a   : > { %v1776_v35 = vpop.permute.xlu0 %407 }
  0x9d   : > { %v1780_v44 = vpop.permute.xlu1 %422 }
  0x9e   : > { %v1782_v47 = vpop.permute.xlu0 %417 }
  0xe9   : > { %v1385_v23 = vpop.f32.mrb[0].mxu0 }
  0xea   : > { %v522_v24 = vadd.f32 %v1385_v23, %v1766_v21  ;;  %v516_v25 = vpop.f32.mrb[1].mxu0 }
  0xeb   : > { %v517_v26 = vadd.f32 %v516_v25, %v1762_v19 }
  0xec   : > { %v556_v27 = vmax.f32 %v522_v24, 0.0 }
  0xed   : > { %v555_v28 = vmax.f32 %v517_v26, 0.0  ;;  %v1388_v29 = vpop.f32.mrb[2].mxu0 }
  0xee   : > { %v532_v30 = vadd.f32 %v1388_v29, %v1768_v22  ;;  %v526_v31 = vpop.f32.mrb[3].mxu0 }
  0xef   : > { %v527_v33 = vadd.f32 %v526_v31, %v1764_v20  ;;  %v1509_v34 = vpack.c.bf16 %v556_v27, %v555_v28 }
  0xf0   : > { %v558_v36 = vmax.f32 %v532_v30, 0.0 }
  0xf1   : > { %v557_v37 = vmax.f32 %v527_v33, 0.0  ;;  %v1391_v38 = vpop.f32.mrb[4].mxu0  ;;  %1510 = vmatprep.subr.bf16.mxu1 %v1509_v34  ;;  %v1306_v33 = vld [vmem:[%s343_s29] sm:$0xff]  }
  0xf2   : > { %v542_v39 = vadd.f32 %v1391_v38, %v1773_v32  ;;  %v536_v40 = vpop.f32.mrb[5].mxu0  ;;  %1512 = vmatpush3.bf16.msra.mxu1 %v1509_v34  ;;  %v1849_v34 = vld [vmem:[%s1919_s5] sm:$0x1] }
  0xf3   : > { %v1513_v41 = vpack.c.bf16 %v558_v36, %v557_v37  ;;  %v537_v42 = vadd.f32 %v536_v40, %v1776_v35 }
  0xf4   : > { %v560_v43 = vmax.f32 %v542_v39, 0.0 }
  0xf5   : > { %v559_v45 = vmax.f32 %v537_v42, 0.0  ;;  %v1394_v46 = vpop.f32.mrb[6].mxu0  ;;  %1514 = vmatprep.subr.bf16.mxu1 %v1513_v41 }
  0xf6   : > { %v552_v48 = vadd.f32 %v1394_v46, %v1780_v44  ;;  %v546_v49 = vpop.f32.mrb[7].mxu0  ;;  %1516 = vmatpush3.bf16.msra.mxu1 %v1513_v41 }
  0xf7   : > { %v1517_v50 = vpack.c.bf16 %v560_v43, %v559_v45  ;;  %v547_v51 = vadd.f32 %v546_v49, %v1782_v47 }
  0xf8   : > { %v562_v52 = vmax.f32 %v552_v48, 0.0 }
  0xf9   : > { %v561_v53 = vmax.f32 %v547_v51, 0.0  ;;  %1518 = vmatprep.subr.bf16.mxu1 %v1517_v50 }
  0xfa   : > { %1520 = vmatpush3.bf16.msra.mxu1 %v1517_v50 }
  0xfb   : > { %v1521_v54 = vpack.c.bf16 %v562_v52, %v561_v53 }
  0xfd   : > { %1522 = vmatprep.subr.bf16.mxu1 %v1521_v54 }
  0xfe   : > { %1524 = vmatpush3.bf16.msra.mxu1 %v1521_v54 }
 0x101   : > { %1412 = vmatmul.mubr.msk.f32.vlgmr.msra.gmra.mrb[0].mxu1 %vm563_vm1, %v1789_v55 }
 0x102   : > { %1414 = vmatprep.mubr.msk.f32.mxu1 %vm563_vm1, %v1794_v56 }
 0x105   : > { %1415 = vmatmul.mubr.msk.f32.gmra.mrb[2].mxu1 %vm563_vm1, %v1803_v57 }
 0x106   : > { %1417 = vmatprep.mubr.msk.f32.mxu1 %vm563_vm1, %v1808_v58 }
 0x109   : > { %1418 = vmatmul.mubr.msk.f32.gmra.mrb[4].mxu1 %vm563_vm1, %v1817_v59 }
 0x10a   : > { %1420 = vmatprep.mubr.msk.f32.mxu1 %vm563_vm1, %v1822_v60 }
 0x10d   : > { %1421 = vmatmul.mubr.msk.f32.gmra.mrb[6].mxu1 %vm563_vm1, %v1831_v61 }
 0x10e   : > { %1474 = vmatprep.mubr.msk.f32.mxu1 %vm563_vm1, %v364_v18 }
 0x1d4   : > { %v1413_v1 = vpop.f32.mrb[0].mxu1 }
 0x1d5   : > { %v694_v2 = vmax.f32 %v1413_v1, 0.0  ;;  %v654_v3 = vpop.f32.mrb[1].mxu1 }
 0x1d6   : > { %v693_v4 = vmax.f32 %v654_v3, 0.0 }
 0x1d8   : > { %v1526_v6 = vpack.c.bf16 %v694_v2, %v693_v4  ;;  %v1416_v8 = vpop.f32.mrb[2].mxu1 }
 0x1d9   : > { %v696_v10 = vmax.f32 %v1416_v8, 0.0  ;;  %v664_v12 = vpop.f32.mrb[3].mxu1 }
 0x1da   : > { %v695_v14 = vmax.f32 %v664_v12, 0.0  ;;  %1527 = vmatpush3.bf16.msra.mxu0 %v1526_v6 }
 0x1db   : > { %1528 = vmatprep.subr.bf16.mxu0 %v1634_v62 }
 0x1dc   : > { %v1529_v16 = vpack.c.bf16 %v696_v10, %v695_v14  ;;  %v1419_v18 = vpop.f32.mrb[4].mxu1 }
 0x1dd   : > { %v698_v23 = vmax.f32 %v1419_v18, 0.0  ;;  %v674_v24 = vpop.f32.mrb[5].mxu1 }
 0x1de   : > { %v697_v25 = vmax.f32 %v674_v24, 0.0  ;;  %1530 = vmatpush3.bf16.msra.mxu0 %v1529_v16 }
 0x1df   : > { %1531 = vmatprep.subr.bf16.mxu0 %v1634_v62 }
 0x1e0   : > { %v1532_v26 = vpack.c.bf16 %v698_v23, %v697_v25  ;;  %v1422_v27 = vpop.f32.mrb[6].mxu1 }
 0x1e1   : > { %v700_v28 = vmax.f32 %v1422_v27, 0.0  ;;  %v684_v29 = vpop.f32.mrb[7].mxu1 }
 0x1e2   : > { %v699_v30 = vmax.f32 %v684_v29, 0.0  ;;  %1533 = vmatpush3.bf16.msra.mxu0 %v1532_v26 }
 0x1e3   : > { %1534 = vmatprep.subr.bf16.mxu0 %v1634_v62 }
 0x1e4   : > { %v1535_v31 = vpack.c.bf16 %v700_v28, %v699_v30 }
 0x1e6   : > { %1536 = vmatpush3.bf16.msra.mxu0 %v1535_v31 }
 0x1e7   : > { %1538 = vmatprep.subr.bf16.mxu0 %v1306_v33 }
 0x1e9   : > { %1440 = vmatmul.mubr.msk.f32.vlgmr.msra.gmra.mrb[8].mxu0 %vm563_vm1, %v1849_v34 }
 0x1ea   : > { %1540 = vmatpush3.bf16.msra.mxu0 %v1306_v33  ;;  %1446 = vmatprep.mubr.msk.f32.mxu0 %vm425_vm0, %v1693_v0 }
 0x1eb   : > { %1557 = vmatprep.subr.bf16.mxu0 %v1634_v62 }
 0x1ed   : > { %1447 = vmatmul.mubr.msk.f32.vlgmr.msra.gmra.mrb[10].mxu0 %vm425_vm0, %v1712_v5 }
 0x1ee   : > { %1449 = vmatprep.mubr.msk.f32.mxu0 %vm425_vm0, %v1717_v7 }
 0x1f1   : > { %1450 = vmatmul.mubr.msk.f32.gmra.mrb[12].mxu0 %vm425_vm0, %v1726_v9 }
 0x1f2   : > { %1452 = vmatprep.mubr.msk.f32.mxu0 %vm425_vm0, %v1731_v11 }
 0x1f5   : > { %1453 = vmatmul.mubr.msk.f32.gmra.mrb[14].mxu0 %vm425_vm0, %v1740_v13 }
 0x1f6   : > { %1455 = vmatprep.mubr.msk.f32.mxu0 %vm425_vm0, %v1745_v15 }
 0x1f9   : > { %1456 = vmatmul.mubr.msk.f32.gmra.mrb[16].mxu0 %vm425_vm0, %v1754_v17 }
 0x1fa   : > { %1502 = vmatprep.mubr.msk.f32.mxu0 %vm1636_vm2, %v1635_v63 }
 0x2bc   : > { %v1871_v0 = vpop.f32.mrb[8].mxu0 }
 0x2bd   : > { %v1441_v5 = vpop.f32.mrb[9].mxu0  ;;  %v1074_v16 = vsub.f32 0.0, %v1871_v0 }
 0x2bf   : > { %v1076_v18 = vand.u32 2147483647, %v1074_v16 }
 0x2c0   : > { %v1448_v7 = vpop.f32.mrb[10].mxu0 }
 0x2c1   : > { %v850_v9 = vadd.f32 %v1448_v7, %v1766_v21  ;;  %v844_v36 = vpop.f32.mrb[11].mxu0  ;;  %v1077_v23 = vsub.f32 0.0, %v1076_v18 }
 0x2c2   : > { %v845_v11 = vadd.f32 %v844_v36, %v1762_v19 }
 0x2c3   : > { %v884_v37 = vmax.f32 %v850_v9, 0.0  ;;  %v1078_v24 = vmul.f32 1.442695, %v1077_v23 }
 0x2c4   : > { %v883_v38 = vmax.f32 %v845_v11, 0.0  ;;  %v1451_v13 = vpop.f32.mrb[12].mxu0 }
 0x2c5   : > { %v860_v39 = vadd.f32 %v1451_v13, %v1768_v22  ;;  %v854_v15 = vpop.f32.mrb[13].mxu0  ;;  %1601 = vpow2.f32 %v1078_v24 }
 0x2c6   : > { %v1541_v40 = vpack.c.bf16 %v884_v37, %v883_v38  ;;  %v855_v17 = vadd.f32 %v854_v15, %v1764_v20  ;;  %v1113_v37 = vlaneseq }
 0x2c7   : > { %v886_v41 = vmax.f32 %v860_v39, 0.0 }
 0x2c8   : > { %v885_v42 = vmax.f32 %v855_v17, 0.0  ;;  %v1454_v43 = vpop.f32.mrb[14].mxu0  ;;  %1542 = vmatprep.subr.bf16.mxu1 %v1541_v40 }
 0x2c9   : > { %v870_v45 = vadd.f32 %v1454_v43, %v1773_v32  ;;  %v864_v46 = vpop.f32.mrb[15].mxu0  ;;  %1544 = vmatpush3.bf16.msra.mxu1 %v1541_v40 }
 0x2ca   : > { %v1545_v21 = vpack.c.bf16 %v886_v41, %v885_v42  ;;  %v865_v19 = vadd.f32 %v864_v46, %v1776_v35  ;;  %v1114_v41 = vand.u32 127, %v1113_v37  ;;  %v1075_v42 = vmax.f32 %v1074_v16, 0.0 }
 0x2cb   : > { %v888_v48 = vmax.f32 %v870_v45, 0.0 }
 0x2cc   : > { %v887_v49 = vmax.f32 %v865_v19, 0.0  ;;  %v1457_v50 = vpop.f32.mrb[16].mxu0  ;;  %1546 = vmatprep.subr.bf16.mxu1 %v1545_v21  ;;  %vm1118_vm5 = vcmp.lt.s32.totalorder %v1114_v41, 64 }
 0x2cd   : > { %v880_v22 = vadd.f32 %v1457_v50, %v1780_v44  ;;  %v874_v51 = vpop.f32.mrb[17].mxu0  ;;  %1548 = vmatpush3.bf16.msra.mxu1 %v1545_v21 }
 0x2ce   : > { %v1549_v20 = vpack.c.bf16 %v888_v48, %v887_v49  ;;  %v875_v52 = vadd.f32 %v874_v51, %v1782_v47  ;;  %v1115_v48 = vld [vmem:[#allocation2] sm:$0x1] }
 0x2cf   : > { %v890_v53 = vmax.f32 %v880_v22, 0.0  ;;  %v1602_v30 = vpop.eup %1601 }
 0x2d0   : > { %v889_v54 = vmax.f32 %v875_v52, 0.0  ;;  %1550 = vmatprep.subr.bf16.mxu1 %v1549_v20  ;;  %v1080_v31 = vadd.f32 1.0, %v1602_v30  ;;  %v1083_v5 = vmul.f32 -0.5, %v1602_v30  ;;  %v1086_v9 = vand.u32 2147483647, %v1602_v30 }
 0x2d1   : > { %1552 = vmatpush3.bf16.msra.mxu1 %v1549_v20 }
 0x2d2   : > { %v1553_v32 = vpack.c.bf16 %v890_v53, %v889_v54  ;;  %v1084_v0 = vadd.f32 1.0, %v1083_v5  ;;  %vm1087_vm3 = vcmp.lt.f32.partialorder %v1086_v9, 0.0004427343 }
 0x2d4   : > { %1554 = vmatprep.subr.bf16.mxu1 %v1553_v32  ;;  %v1085_v13 = vmul.f32 %v1602_v30, %v1084_v0 }
 0x2d5   : > { %1556 = vmatpush3.bf16.msra.mxu1 %v1553_v32 }
 0x2d8   : > { %1475 = vmatmul.mubr.msk.f32.vlgmr.msra.gmra.mrb[8].mxu1 %vm563_vm1, %v1789_v55 }
 0x2d9   : > { %1477 = vmatprep.mubr.msk.f32.mxu1 %vm563_vm1, %v1794_v56 }
 0x2dc   : > { %1478 = vmatmul.mubr.msk.f32.gmra.mrb[10].mxu1 %vm563_vm1, %v1803_v57 }
 0x2dd   : > { %1480 = vmatprep.mubr.msk.f32.mxu1 %vm563_vm1, %v1808_v58 }
 0x2e0   : > { %1481 = vmatmul.mubr.msk.f32.gmra.mrb[12].mxu1 %vm563_vm1, %v1817_v59 }
 0x2e1   : > { %1483 = vmatprep.mubr.msk.f32.mxu1 %vm563_vm1, %v1822_v60 }
 0x2e4   : > { %1484 = vmatmul.mubr.msk.f32.gmra.mrb[14].mxu1 %vm563_vm1, %v1831_v61 }
 0x3ab   : > { %v1476_v35 = vpop.f32.mrb[8].mxu1 }
 0x3ac   : > { %v997_v44 = vmax.f32 %v1476_v35, 0.0  ;;  %v957_v47 = vpop.f32.mrb[9].mxu1 }
 0x3ad   : > { %v996_v55 = vmax.f32 %v957_v47, 0.0 }
 0x3af   : > { %v1558_v56 = vpack.c.bf16 %v997_v44, %v996_v55  ;;  %v1479_v63 = vpop.f32.mrb[10].mxu1 }
 0x3b0   : > { %v999_v1 = vmax.f32 %v1479_v63, 0.0  ;;  %v967_v57 = vpop.f32.mrb[11].mxu1 }
 0x3b1   : > { %v998_v2 = vmax.f32 %v967_v57, 0.0  ;;  %1559 = vmatpush3.bf16.msra.mxu0 %v1558_v56 }
 0x3b2   : > { %1560 = vmatprep.subr.bf16.mxu0 %v1634_v62 }
 0x3b3   : > { %v1561_v58 = vpack.c.bf16 %v999_v1, %v998_v2  ;;  %v1482_v59 = vpop.f32.mrb[12].mxu1 }
 0x3b4   : > { %v1001_v3 = vmax.f32 %v1482_v59, 0.0  ;;  %v977_v4 = vpop.f32.mrb[13].mxu1 }
 0x3b5   : > { %v1000_v60 = vmax.f32 %v977_v4, 0.0  ;;  %1562 = vmatpush3.bf16.msra.mxu0 %v1561_v58 }
 0x3b6   : > { %1563 = vmatprep.subr.bf16.mxu0 %v1634_v62 }
 0x3b7   : > { %v1564_v61 = vpack.c.bf16 %v1001_v3, %v1000_v60  ;;  %v1485_v6 = vpop.f32.mrb[14].mxu1 }
 0x3b8   : > { %v1003_v8 = vmax.f32 %v1485_v6, 0.0  ;;  %v987_v10 = vpop.f32.mrb[15].mxu1 }
 0x3b9   : > { %v1002_v12 = vmax.f32 %v987_v10, 0.0  ;;  %1565 = vmatpush3.bf16.msra.mxu0 %v1564_v61 }
 0x3ba   : > { %1566 = vmatprep.subr.bf16.mxu0 %v1634_v62 }
 0x3bb   : > { %v1567_v14 = vpack.c.bf16 %v1003_v8, %v1002_v12 }
 0x3bd   : > { %1568 = vmatpush3.bf16.msra.mxu0 %v1567_v14 }
 0x3c0   : > { %1503 = vmatmul.mubr.msk.f32.vlgmr.msra.gmra.mrb[18].mxu0 %vm563_vm1, %v1849_v34 }
 0x493   : > { %v1070_v25 = vpop.f32.mrb[18].mxu0 }
 0x494   : > { %v1091_v26 = vand.u32 2147483647, %v1070_v25  ;;  %v1504_v27 = vpop.f32.mrb[19].mxu0  ;;  %v1090_v43 = vmax.f32 %v1070_v25, 0.0 }
 0x496   : > { %v1092_v28 = vsub.f32 0.0, %v1091_v26 }
 0x498   : > { %v1093_v29 = vmul.f32 1.442695, %v1092_v28 }
 0x49a   : > { %1603 = vpow2.f32 %v1093_v29 }
 0x49b   : > { %1605 = vlog2.f32 %v1080_v31 }
 0x4a4   : > { %v1604_v62 = vpop.eup %1603 }
 0x4a5   : > { %v1095_v33 = vadd.f32 1.0, %v1604_v62  ;;  %v1098_v34 = vmul.f32 -0.5, %v1604_v62  ;;  %v1606_v7 = vpop.eup %1605  ;;  %v1101_v38 = vand.u32 2147483647, %v1604_v62 }
 0x4a6   : > { %v1082_v36 = vmul.f32 0.6931472, %v1606_v7 }
 0x4a7   : > { %1607 = vlog2.f32 %v1095_v33  ;;  %v1099_v11 = vadd.f32 1.0, %v1098_v34  ;;  %vm1102_vm4 = vcmp.lt.f32.partialorder %v1101_v38, 0.0004427343 }
 0x4a8   : > { %v1088_v15 = vsel %vm1087_vm3, %v1085_v13, %v1082_v36 }
 0x4a9   : > { %v1100_v17 = vmul.f32 %v1604_v62, %v1099_v11  ;;  %v1089_v46 = vadd.f32 %v1088_v15, %v1075_v42 }
 0x4b1   : > { %v1608_v39 = vpop.eup %1607 }
 0x4b2   : > { %v1097_v40 = vmul.f32 0.6931472, %v1608_v39 }
 0x4b4   : > { %v1103_v45 = vsel %vm1102_vm4, %v1100_v17, %v1097_v40 }
 0x4b5   : > { %v1104_v21 = vadd.f32 %v1103_v45, %v1090_v43 }
 0x4b7   : > { %v1105_v19 = vadd.f32 %v1104_v21, %v1089_v46 }
 0x4b9   : > { %v1119_v49 = vsel %vm1118_vm5, %v1105_v19, 0.0 }
 0x4ba   : > { %v1120_v50 = vadd.f32 %v1119_v49, %v1115_v48 }
 0x4bc   : > { %1121 = vst [vmem:[#allocation2] sm:$0x1] %v1120_v50 }
 0x4c3   : > { %v1132_v22 = vld [vmem:[#allocation2] sm:$0x1] }
 0x4c4   : > { %v1134_v51 = vsel %vm1133_vm6, %v1132_v22, 0.0 }
 0x4c5   : > { %1135 = vadd.xlane.f32.xlu0 %v1134_v51 }
 0x552   : > { %v1136_v20 = vpop.xlane.xlu0 %1135 }
 0x553   : > { %v1137_v52 = vrot.slane %v1136_v20, 4 }
 0x555   : > { %v1138_v53 = vadd.f32 %v1137_v52, %v1136_v20 }
 0x557   : > { %v1139_v54 = vrot.slane %v1138_v53, 2 }
 0x559   : > { %v1140_v32 = vadd.f32 %v1139_v54, %v1138_v53 }
 0x55b   : > { %v1141_v35 = vrot.slane %v1140_v32, 1 }
 0x55d   : > { %v1142_v44 = vadd.f32 %v1141_v35, %v1140_v32 }
 0x55f   : > { %1569 = vpush %v1142_v44 }
 0x590   : > { %s1570_s10 = spop %1569 }
 0x591   : > { %v1144_v47 = vstv %s1570_s10 }
 0x592   : > { %1146 = vst.msk [vmem:[%s350_s9] sm:$0x1] %vm1145_vm7, %v1144_v47 }
 0x593 PF: > { %s16_s23 = sadd.s32 1, %s1631_s23   ;;  %s1921_s21 = smov %s1627_s22 }
 0x594   : > { %p13_p5 = scmp.ge.s32.totalorder %s16_s23, 4   ;;  %s1922_s22 = smov %s1924_s24 }
 0x596   :  { %15 = sbr.rel (!%p13_p5) target bundleno = 2 (0x2), region = 96 }

</bundles_post_ra>
